<compile_context>
chip_gen: v5e
topology: v5e:2x2
jax: 0.10.0
libtpu: 0.0.40
codegen_flags: <defaults>
</compile_context>

<pallas_src>
import jax
import jax.numpy as jnp
from jax.experimental import pallas as pl
from jax.experimental.pallas import tpu as pltpu


def _se_mul_kernel(x_ref, s_ref, o_ref):
    # x_ref: (tile_r, cols) activation tile.
    # s_ref: (padded_rows, 1) resident per-channel scale (fetched once).
    tile_r = x_ref.shape[0]
    r0 = pl.multiple_of(pl.program_id(0) * tile_r, tile_r)
    s = s_ref[pl.ds(r0, tile_r), :]
    out_dtype = o_ref.dtype
    o_ref[...] = x_ref[...].astype(out_dtype) * s.astype(out_dtype)


def _choose_tile_r(rows, row_bytes, sub, target_block_bytes):
    """Pick a sublane-aligned rows-per-block.

    Priorities:
      1. one activation block stays <= target_block_bytes,
      2. the grid has >= 4 steps when rows allow it (pipeline overlap and both
         v7x TensorCores engaged),
      3. tile_r divides rows, preferring an even grid (no masked tail block,
         equal per-core step count).
    """
    if rows <= sub:
        return rows
    cap = max(sub, (target_block_bytes // max(1, row_bytes)) // sub * sub)
    if rows >= 4 * sub:
        # Cap so the grid has at least 4 steps.
        cap = min(cap, max(sub, ((rows // 4) // sub) * sub))
    cap = min(max(cap, sub), rows)
    cap = (cap // sub) * sub

    best_even = None
    best_any = None
    t = cap
    while t >= sub:
        if rows % t == 0:
            if best_any is None:
                best_any = t
            if (rows // t) % 2 == 0:
                best_even = t
                break
        t -= sub
    if best_even is not None:
        return best_even
    if best_any is not None:
        return best_any
    return cap


def se_multiply(x, scale, *, target_block_bytes=2 * 1024 * 1024):
    """x * scale with scale broadcast over spatial dims (SE gate).

    x:     (N, C, H, W) in its native dtype (no wrapper up-cast)
    scale: (N, C, 1, 1)
    returns (N, C, H, W) in the promoted dtype (matches torch mul semantics).
    """
    N, C, H, W = x.shape
    assert scale.shape == (N, C, 1, 1)
    out_dtype = jnp.promote_types(x.dtype, scale.dtype)

    rows, cols = N * C, H * W
    # Pure views of the contiguous NCHW layout: channels -> sublanes,
    # spatial -> lanes. No data movement.
    x2 = x.reshape(rows, cols)
    s2 = scale.reshape(rows, 1)

    in_item = jnp.dtype(x.dtype).itemsize
    s_item = jnp.dtype(scale.dtype).itemsize
    out_item = jnp.dtype(out_dtype).itemsize
    # Sublane quantum of the narrowest participating dtype (8 f32, 16 bf16).
    sub = max(8, 32 // min(in_item, out_item))

    tile_r = _choose_tile_r(rows, cols * max(in_item, out_item), sub,
                            target_block_bytes)
    grid_r = pl.cdiv(rows, tile_r)

    # Resident scale: pad (tiny, N*C elements) so the in-kernel pl.ds window
    # is always in-bounds even on a partial trailing activation block.
    padded_rows = grid_r * tile_r
    if padded_rows != rows:
        s2 = jnp.pad(s2, ((0, padded_rows - rows), (0, 0)))

    cost = pl.CostEstimate(
        flops=rows * cols,
        transcendentals=0,
        bytes_accessed=rows * cols * in_item
        + padded_rows * s_item
        + rows * cols * out_item,
    )

    out = pl.pallas_call(
        _se_mul_kernel,
        out_shape=jax.ShapeDtypeStruct((rows, cols), out_dtype),
        grid=(grid_r,),
        in_specs=[
            pl.BlockSpec((tile_r, cols), lambda i: (i, 0)),
            # Constant block index -> fetched once, held resident in VMEM.
            pl.BlockSpec((padded_rows, 1), lambda i: (0, 0)),
        ],
        out_specs=pl.BlockSpec((tile_r, cols), lambda i: (i, 0)),
        compiler_params=pltpu.CompilerParams(
            dimension_semantics=("parallel",),
        ),
        cost_estimate=cost,
    )(x2, s2)

    return out.reshape(N, C, H, W)


if __name__ == "__main__":
    key = jax.random.PRNGKey(0)
    k1, k2, k3, k4, k5, k6 = jax.random.split(key, 6)

    # Exact module shape: (1, 480, 28, 28) * (1, 480, 1, 1).
    # -> rows=480, tile_r=120, grid=(4,) (even), ~367 KiB blocks, scale resident.
    x253 = jax.random.normal(k1, (1, 480, 28, 28), dtype=jnp.float32)
    x258 = jax.random.normal(k2, (1, 480, 1, 1), dtype=jnp.float32)
    out = se_multiply(x253, x258)
    jax.block_until_ready(out)
    ref = x253 * x258
    assert out.shape == ref.shape and out.dtype == ref.dtype
    assert jnp.allclose(out, ref, atol=1e-6, rtol=1e-6)

    # Non-divisible fallback: rows=84 has no sublane-aligned divisor, so the
    # last block is partial and the resident scale gets padded (84 -> 96).
    xa = jax.random.normal(k3, (2, 42, 16, 16), dtype=jnp.float32)
    sa = jax.random.normal(k4, (2, 42, 1, 1), dtype=jnp.float32)
    out_a = se_multiply(xa, sa, target_block_bytes=16 * 1024)
    jax.block_until_ready(out_a)
    assert jnp.allclose(out_a, xa * sa, atol=1e-6, rtol=1e-6)

    # bf16 x bf16: computed natively in bf16 inside the kernel.
    xb = jax.random.normal(k5, (2, 64, 16, 16), dtype=jnp.bfloat16)
    sb = jax.random.normal(k6, (2, 64, 1, 1), dtype=jnp.bfloat16)
    out_b = se_multiply(xb, sb)
    jax.block_until_ready(out_b)
    ref_b = xb * sb
    assert out_b.dtype == ref_b.dtype
    assert jnp.allclose(out_b.astype(jnp.float32), ref_b.astype(jnp.float32),
                        atol=1e-2, rtol=1e-2)

    print("KERNEL_OK")
</pallas_src>

<mosaic_0001>
module attributes {stable_mosaic.version = 11 : i64} {
  func.func @_se_mul_kernel(%arg0: i32, %arg1: memref<120x784xf32, #tpu.memory_space<vmem>>, %arg2: memref<480x1xf32, #tpu.memory_space<vmem>>, %arg3: memref<120x784xf32, #tpu.memory_space<vmem>>) attributes {dimension_semantics = [#tpu.dimension_semantics<parallel>], iteration_bounds = array<i64: 4>, scalar_prefetch = 0 : i64, scratch_operands = 0 : i64, tpu.core_type = #tpu.core_type<tc>, window_params = [{transform_indices = @transform_0, window_bounds = array<i64: 120, 784>}, {pipeline_mode = #tpu.pipeline_mode<synchronous>, transform_indices = @transform_1, window_bounds = array<i64: 480, 1>}, {transform_indices = @transform_2, window_bounds = array<i64: 120, 784>}]} {
    %c120_i32 = arith.constant 120 : i32
    %0 = arith.muli %arg0, %c120_i32 : i32
    %1 = tpu.assume_multiple %0, 120 : i32
    %2 = arith.index_cast %1 : i32 to index
    %c0 = arith.constant 0 : index
    %3 = vector.load %arg2[%2, %c0] : memref<480x1xf32, #tpu.memory_space<vmem>>, vector<120x1xf32>
    %c0_0 = arith.constant 0 : index
    %c0_1 = arith.constant 0 : index
    %4 = vector.load %arg1[%c0_0, %c0_1] : memref<120x784xf32, #tpu.memory_space<vmem>>, vector<120x784xf32>
    %5 = vector.broadcast %3 : vector<120x1xf32> to vector<120x784xf32>
    %6 = arith.mulf %4, %5 : vector<120x784xf32>
    %c0_2 = arith.constant 0 : index
    %c0_3 = arith.constant 0 : index
    %7 = vector.load %arg3[%c0_2, %c0_3] : memref<120x784xf32, #tpu.memory_space<vmem>>, vector<120x784xf32>
    tpu.vector_store %arg3[%c0_2, %c0_3], %6 {strides = array<i32>} : memref<120x784xf32, #tpu.memory_space<vmem>>, vector<120x784xf32>,
    return
  }
  func.func @transform_0(%arg0: i32) -> (i32, i32) {
    %c0_i32 = arith.constant 0 : i32
    %c0_i32_0 = arith.constant 0 : i32
    return %arg0, %c0_i32 : i32, i32
  }
  func.func @transform_1(%arg0: i32) -> (i32, i32) {
    %c0_i32 = arith.constant 0 : i32
    %c0_i32_0 = arith.constant 0 : i32
    %c0_i32_1 = arith.constant 0 : i32
    return %c0_i32, %c0_i32_0 : i32, i32
  }
  func.func @transform_2(%arg0: i32) -> (i32, i32) {
    %c0_i32 = arith.constant 0 : i32
    %c0_i32_0 = arith.constant 0 : i32
    return %arg0, %c0_i32 : i32, i32
  }
}

</mosaic_0001>

<bundles_post_ra>
// kernel: tpu_custom_call.1
= control target key start
LH: loop header
LB: loop body
LE: loop exit
PB: predicated region body
PF: predicated region fallthrough
CT: control target
= control target key end

     0   :  { %s666_s9 = smov 0   ;;  %s919_s0 = inlined_call_operand.vmem [shape: f32[480,784], index: 0, kind: input, shape index: {}]   ;;  %s920_s1 = inlined_call_operand.vmem [shape: f32[480,1], index: 1, kind: input, shape index: {}]   ;;  %s921_s2 = inlined_call_operand.vmem [shape: f32[480,784], index: 2, kind: output, shape index: {}]  }
   0x1 LB: > { %s620_s10 = sadd.s32 4294967295, %s648_s9   ;;  %p624_p0 = scmp.ge.s32.totalorder %s648_s9, 1  ;;  %s648_s9 = sphi %s666_s9, %s12_s9  }
   0x2   : > { %p114_p1 = scmp.lt.s32.totalorder %s648_s9, 5 }
   0x4   : > { %p115_p2 = pnand %p624_p0, %p114_p1 }
   0x5   : > { %s152_s11 = smul.u32 (!%p115_p2), 120, %s620_s10 }
   0x6   : > { %118 = sbr.rel (%p115_p2) target bundleno = 214 (0xd6), region = 28 }
   0x7   : > { %s153_s14 = scalar_lea.vmem (!%p115_p2), %s920_s1, %s152_s11  ;;  %s138_s15 = smul.u32 (!%p115_p2), 15, %s620_s10 }
   0x9   : > { %p139_p3 = scmp.lt.s32.totalorder (!%p115_p2), %s138_s15, 59 }
   0xb   : > { %v650_v0 = vmov 0   ;;  %v158_v1 = vld [vmem:[%s153_s14 + $0x20] sm:$0xff]  ;;  %v156_v2 = vld [vmem:[%s153_s14 + $0x10] sm:$0xff]  ;;  %v159_v4 = vld [vmem:[%s153_s14 + $0x28] sm:$0xff]  ;;  %s923_s15 = smov (!%p139_p3, %s138_s15), 59  ;;  %vm460_vm0 = vcmask 130048  }
   0xc   : > { %641 = vset.pattern.permute.xlu2 %v650_v0  ;;  %640 = vset.pattern.permute.xlu1 %v650_v0  ;;  %v154_v3 = vld [vmem:[%s153_s14] sm:$0xff]  ;;  %v157_v5 = vld [vmem:[%s153_s14 + $0x18] sm:$0xff]  ;;  %v155_v6 = vld [vmem:[%s153_s14 + $0x8] sm:$0xff]  ;;  %s629_s16 = smul.u32 56, %s923_s15 }
   0xd   : > { %639 = vset.pattern.permute.xlu0 %v650_v0  ;;  %296 = vperm.xlu2 %641, %v158_v1   ;;  %v162_v7 = vld [vmem:[%s153_s14 + $0x40] sm:$0xff]  ;;  %v161_v8 = vld [vmem:[%s153_s14 + $0x38] sm:$0xff]  ;;  %v160_v9 = vld [vmem:[%s153_s14 + $0x30] sm:$0xff] }
   0xe   : > { %286 = vperm.xlu1 %640, %v156_v2   ;;  %276 = vperm.xlu0 %639, %v154_v3   ;;  %v165_v10 = vld [vmem:[%s153_s14 + $0x58] sm:$0xff]  ;;  %v164_v11 = vld [vmem:[%s153_s14 + $0x50] sm:$0xff]  ;;  %v163_v12 = vld [vmem:[%s153_s14 + $0x48] sm:$0xff]  ;;  %s684_s19 = scalar_lea.vmem %s919_s0, %s629_s16  ;;  %s693_s22 = scalar_lea.vmem %s921_s2, %s629_s16 }
   0xf   : > { %v168_v13 = vld [vmem:[%s153_s14 + $0x70] sm:$0xff]  ;;  %v167_v14 = vld [vmem:[%s153_s14 + $0x68] sm:$0xff]  ;;  %v166_v15 = vld [vmem:[%s153_s14 + $0x60] sm:$0xff] }
  0x10   : > { %v197_v16 = vld [vmem:[%s684_s19 + $0xe0] sm:$0xff]  ;;  %v198_v17 = vld [vmem:[%s684_s19 + $0xe8] sm:$0xff]  ;;  %v199_v18 = vld [vmem:[%s684_s19 + $0xf0] sm:$0xff] }
  0x11   : > { %v200_v19 = vld [vmem:[%s684_s19 + $0xf8] sm:$0xff]  ;;  %v201_v21 = vld [vmem:[%s684_s19 + $0x100] sm:$0xff]  ;;  %v202_v22 = vld [vmem:[%s684_s19 + $0x108] sm:$0xff] }
  0x12   : > { %v203_v26 = vld [vmem:[%s684_s19 + $0x110] sm:$0xff]  ;;  %v204_v31 = vld [vmem:[%s684_s19 + $0x118] sm:$0xff]  ;;  %v205_v32 = vld [vmem:[%s684_s19 + $0x120] sm:$0xff] }
  0x13   : > { %v206_v33 = vld [vmem:[%s684_s19 + $0x128] sm:$0xff]  ;;  %v207_v34 = vld [vmem:[%s684_s19 + $0x130] sm:$0xff]  ;;  %v208_v36 = vld [vmem:[%s684_s19 + $0x138] sm:$0xff] }
  0x14   : > { %v209_v37 = vld [vmem:[%s684_s19 + $0x140] sm:$0xff]  ;;  %v210_v41 = vld [vmem:[%s684_s19 + $0x148] sm:$0xff]  ;;  %v227_v48 = vld [vmem:[%s684_s19 + $0x1d0] sm:$0xff] }
  0x15   : > { %301 = vperm.xlu2 %641, %v159_v4   ;;  %v225_v46 = vld [vmem:[%s684_s19 + $0x1c0] sm:$0xff]  ;;  %v226_v47 = vld [vmem:[%s684_s19 + $0x1c8] sm:$0xff]  ;;  %v228_v49 = vld [vmem:[%s684_s19 + $0x1d8] sm:$0xff] }
  0x16   : > { %291 = vperm.xlu1 %640, %v157_v5   ;;  %281 = vperm.xlu0 %639, %v155_v6   ;;  %v229_v51 = vld [vmem:[%s684_s19 + $0x1e0] sm:$0xff]  ;;  %v230_v52 = vld [vmem:[%s684_s19 + $0x1e8] sm:$0xff]  ;;  %v231_v56 = vld [vmem:[%s684_s19 + $0x1f0] sm:$0xff] }
  0x17   : > { %v246_v61 = vld [vmem:[%s684_s19 + $0x268] sm:$0xff]  ;;  %v247_v62 = vld [vmem:[%s684_s19 + $0x270] sm:$0xff]  ;;  %v248_v63 = vld [vmem:[%s684_s19 + $0x278] sm:$0xff] }
  0x18   : > { %v249_v0 = vld [vmem:[%s684_s19 + $0x280] sm:$0xff]  ;;  %v250_v2 = vld [vmem:[%s684_s19 + $0x288] sm:$0xff]  ;;  %v251_v3 = vld [vmem:[%s684_s19 + $0x290] sm:$0xff] }
  0x1d   : > { %316 = vperm.xlu2 %641, %v162_v7   ;;  %v252_v7 = vld [vmem:[%s684_s19 + $0x298] sm:$0xff] }
  0x1e   : > { %311 = vperm.xlu1 %640, %v161_v8   ;;  %306 = vperm.xlu0 %639, %v160_v9  }
  0x25   : > { %331 = vperm.xlu2 %641, %v165_v10  }
  0x26   : > { %326 = vperm.xlu1 %640, %v164_v11   ;;  %321 = vperm.xlu0 %639, %v163_v12   ;;  %v183_v11 = vld [vmem:[%s684_s19 + $0x70] sm:$0xff] }
  0x2d   : > { %346 = vperm.xlu2 %641, %v168_v13   ;;  %v184_v13 = vld [vmem:[%s684_s19 + $0x78] sm:$0xff] }
  0x2e   : > { %341 = vperm.xlu1 %640, %v167_v14   ;;  %336 = vperm.xlu0 %639, %v166_v15   ;;  %v185_v15 = vld [vmem:[%s684_s19 + $0x80] sm:$0xff] }
  0x67   : > { %v297_v20 = vpop.permute.xlu2 %296 }
  0x68   : > { %v377_v23 = vmul.f32 %v297_v20, %v197_v16  ;;  %v378_v24 = vmul.f32 %v297_v20, %v198_v17  ;;  %v379_v25 = vmul.f32 %v297_v20, %v199_v18  ;;  %v380_v27 = vmul.f32 %v297_v20, %v200_v19  ;;  %v186_v16 = vld [vmem:[%s684_s19 + $0x88] sm:$0xff]  ;;  %v187_v18 = vld [vmem:[%s684_s19 + $0x90] sm:$0xff] }
  0x69   : > { %v381_v28 = vmul.f32 %v297_v20, %v201_v21  ;;  %v382_v29 = vmul.f32 %v297_v20, %v202_v22  ;;  %v383_v30 = vmul.f32 %v297_v20, %v203_v26  ;;  %v188_v20 = vld [vmem:[%s684_s19 + $0x98] sm:$0xff]  ;;  %v189_v22 = vld [vmem:[%s684_s19 + $0xa0] sm:$0xff] }
  0x6a   : > { %483 = vst [vmem:[%s693_s22 + $0xe0] sm:$0xff] %v377_v23  ;;  %v169_v26 = vld [vmem:[%s684_s19] sm:$0xff] }
  0x6b   : > { %484 = vst [vmem:[%s693_s22 + $0xe8] sm:$0xff] %v378_v24 }
  0x6c   : > { %485 = vst [vmem:[%s693_s22 + $0xf0] sm:$0xff] %v379_v25 }
  0x6d   : > { %486 = vst [vmem:[%s693_s22 + $0xf8] sm:$0xff] %v380_v27 }
  0x6e   : > { %487 = vst [vmem:[%s693_s22 + $0x100] sm:$0xff] %v381_v28  ;;  %v170_v28 = vld [vmem:[%s684_s19 + $0x8] sm:$0xff] }
  0x6f   : > { %488 = vst [vmem:[%s693_s22 + $0x108] sm:$0xff] %v382_v29  ;;  %v302_v35 = vpop.permute.xlu2 %301 }
  0x70   : > { %489 = vst.msk [vmem:[%s693_s22 + $0x110] sm:$0xff] %vm460_vm0, %v383_v30  ;;  %v384_v38 = vmul.f32 %v302_v35, %v204_v31  ;;  %v385_v39 = vmul.f32 %v302_v35, %v205_v32  ;;  %v386_v40 = vmul.f32 %v302_v35, %v206_v33  ;;  %v387_v42 = vmul.f32 %v302_v35, %v207_v34  ;;  %v171_v30 = vld [vmem:[%s684_s19 + $0x10] sm:$0xff]  ;;  %v172_v31 = vld [vmem:[%s684_s19 + $0x18] sm:$0xff]  ;;  %v173_v33 = vld [vmem:[%s684_s19 + $0x20] sm:$0xff] }
  0x71   : > { %v388_v43 = vmul.f32 %v302_v35, %v208_v36  ;;  %v389_v44 = vmul.f32 %v302_v35, %v209_v37  ;;  %v390_v45 = vmul.f32 %v302_v35, %v210_v41  ;;  %v174_v35 = vld [vmem:[%s684_s19 + $0x28] sm:$0xff]  ;;  %v175_v37 = vld [vmem:[%s684_s19 + $0x30] sm:$0xff] }
  0x72   : > { %490 = vst [vmem:[%s693_s22 + $0x118] sm:$0xff] %v384_v38  ;;  %v267_v41 = vld [vmem:[%s684_s19 + $0x310] sm:$0xff] }
  0x73   : > { %491 = vst [vmem:[%s693_s22 + $0x120] sm:$0xff] %v385_v39 }
  0x74   : > { %492 = vst [vmem:[%s693_s22 + $0x128] sm:$0xff] %v386_v40 }
  0x75   : > { %493 = vst [vmem:[%s693_s22 + $0x130] sm:$0xff] %v387_v42 }
  0x76   : > { %494 = vst [vmem:[%s693_s22 + $0x138] sm:$0xff] %v388_v43  ;;  %v268_v43 = vld [vmem:[%s684_s19 + $0x318] sm:$0xff] }
  0x77   : > { %495 = vst [vmem:[%s693_s22 + $0x140] sm:$0xff] %v389_v44  ;;  %v317_v50 = vpop.permute.xlu2 %316 }
  0x78   : > { %496 = vst.msk [vmem:[%s693_s22 + $0x148] sm:$0xff] %vm460_vm0, %v390_v45  ;;  %v405_v53 = vmul.f32 %v317_v50, %v225_v46  ;;  %v406_v54 = vmul.f32 %v317_v50, %v226_v47  ;;  %v407_v55 = vmul.f32 %v317_v50, %v227_v48  ;;  %v408_v57 = vmul.f32 %v317_v50, %v228_v49  ;;  %v269_v45 = vld [vmem:[%s684_s19 + $0x320] sm:$0xff]  ;;  %v270_v46 = vld [vmem:[%s684_s19 + $0x328] sm:$0xff]  ;;  %v271_v48 = vld [vmem:[%s684_s19 + $0x330] sm:$0xff] }
  0x79   : > { %v409_v58 = vmul.f32 %v317_v50, %v229_v51  ;;  %v410_v59 = vmul.f32 %v317_v50, %v230_v52  ;;  %v411_v60 = vmul.f32 %v317_v50, %v231_v56  ;;  %v272_v50 = vld [vmem:[%s684_s19 + $0x338] sm:$0xff]  ;;  %v273_v52 = vld [vmem:[%s684_s19 + $0x340] sm:$0xff]  ;;  %v190_v56 = vld [vmem:[%s684_s19 + $0xa8] sm:$0xff] }
  0x7a   : > { %511 = vst [vmem:[%s693_s22 + $0x1c0] sm:$0xff] %v405_v53 }
  0x7b   : > { %512 = vst [vmem:[%s693_s22 + $0x1c8] sm:$0xff] %v406_v54 }
  0x7c   : > { %513 = vst [vmem:[%s693_s22 + $0x1d0] sm:$0xff] %v407_v55 }
  0x7d   : > { %514 = vst [vmem:[%s693_s22 + $0x1d8] sm:$0xff] %v408_v57 }
  0x7e   : > { %515 = vst [vmem:[%s693_s22 + $0x1e0] sm:$0xff] %v409_v58  ;;  %v191_v58 = vld [vmem:[%s684_s19 + $0xb0] sm:$0xff] }
  0x7f   : > { %516 = vst [vmem:[%s693_s22 + $0x1e8] sm:$0xff] %v410_v59  ;;  %v332_v1 = vpop.permute.xlu2 %331 }
  0x80   : > { %517 = vst.msk [vmem:[%s693_s22 + $0x1f0] sm:$0xff] %vm460_vm0, %v411_v60  ;;  %v426_v4 = vmul.f32 %v332_v1, %v246_v61  ;;  %v427_v5 = vmul.f32 %v332_v1, %v247_v62  ;;  %v428_v6 = vmul.f32 %v332_v1, %v248_v63  ;;  %v429_v8 = vmul.f32 %v332_v1, %v249_v0  ;;  %v287_v10 = vpop.permute.xlu1 %286  ;;  %v277_v25 = vpop.permute.xlu0 %276  ;;  %v192_v60 = vld [vmem:[%s684_s19 + $0xb8] sm:$0xff]  ;;  %v193_v61 = vld [vmem:[%s684_s19 + $0xc0] sm:$0xff]  ;;  %v194_v63 = vld [vmem:[%s684_s19 + $0xc8] sm:$0xff] }
  0x81   : > { %v430_v9 = vmul.f32 %v332_v1, %v250_v2  ;;  %v431_v12 = vmul.f32 %v332_v1, %v251_v3  ;;  %v432_v14 = vmul.f32 %v332_v1, %v252_v7  ;;  %v363_v17 = vmul.f32 %v287_v10, %v183_v11  ;;  %v195_v1 = vld [vmem:[%s684_s19 + $0xd0] sm:$0xff]  ;;  %v196_v3 = vld [vmem:[%s684_s19 + $0xd8] sm:$0xff]  ;;  %v178_v11 = vld [vmem:[%s684_s19 + $0x48] sm:$0xff] }
  0x82   : > { %532 = vst [vmem:[%s693_s22 + $0x268] sm:$0xff] %v426_v4  ;;  %v364_v19 = vmul.f32 %v287_v10, %v184_v13  ;;  %v365_v21 = vmul.f32 %v287_v10, %v185_v15  ;;  %v366_v23 = vmul.f32 %v287_v10, %v186_v16  ;;  %v367_v24 = vmul.f32 %v287_v10, %v187_v18  ;;  %v176_v7 = vld [vmem:[%s684_s19 + $0x38] sm:$0xff]  ;;  %v181_v16 = vld [vmem:[%s684_s19 + $0x60] sm:$0xff]  ;;  %v182_v18 = vld [vmem:[%s684_s19 + $0x68] sm:$0xff] }
  0x83   : > { %533 = vst [vmem:[%s693_s22 + $0x270] sm:$0xff] %v427_v5  ;;  %v368_v27 = vmul.f32 %v287_v10, %v188_v20  ;;  %v369_v29 = vmul.f32 %v287_v10, %v189_v22  ;;  %v349_v32 = vmul.f32 %v277_v25, %v169_v26  ;;  %v350_v34 = vmul.f32 %v277_v25, %v170_v28  ;;  %v218_v22 = vld [vmem:[%s684_s19 + $0x188] sm:$0xff]  ;;  %v220_v26 = vld [vmem:[%s684_s19 + $0x198] sm:$0xff] }
  0x84   : > { %534 = vst [vmem:[%s693_s22 + $0x278] sm:$0xff] %v428_v6  ;;  %v351_v36 = vmul.f32 %v277_v25, %v171_v30  ;;  %v352_v38 = vmul.f32 %v277_v25, %v172_v31  ;;  %v353_v39 = vmul.f32 %v277_v25, %v173_v33  ;;  %v354_v42 = vmul.f32 %v277_v25, %v174_v35  ;;  %v223_v31 = vld [vmem:[%s684_s19 + $0x1b0] sm:$0xff]  ;;  %v224_v33 = vld [vmem:[%s684_s19 + $0x1b8] sm:$0xff] }
  0x85   : > { %535 = vst [vmem:[%s693_s22 + $0x280] sm:$0xff] %v429_v8  ;;  %v355_v44 = vmul.f32 %v277_v25, %v175_v37  ;;  %v211_v37 = vld [vmem:[%s684_s19 + $0x150] sm:$0xff] }
  0x86   : > { %536 = vst [vmem:[%s693_s22 + $0x288] sm:$0xff] %v430_v9  ;;  %v177_v9 = vld [vmem:[%s684_s19 + $0x40] sm:$0xff] }
  0x87   : > { %537 = vst [vmem:[%s693_s22 + $0x290] sm:$0xff] %v431_v12  ;;  %v347_v40 = vpop.permute.xlu2 %346  ;;  %v179_v12 = vld [vmem:[%s684_s19 + $0x50] sm:$0xff] }
  0x88   : > { %538 = vst.msk [vmem:[%s693_s22 + $0x298] sm:$0xff] %vm460_vm0, %v432_v14  ;;  %v447_v47 = vmul.f32 %v347_v40, %v267_v41  ;;  %v448_v49 = vmul.f32 %v347_v40, %v268_v43  ;;  %v449_v51 = vmul.f32 %v347_v40, %v269_v45  ;;  %v450_v53 = vmul.f32 %v347_v40, %v270_v46  ;;  %v292_v55 = vpop.permute.xlu1 %291  ;;  %v282_v6 = vpop.permute.xlu0 %281  ;;  %v180_v14 = vld [vmem:[%s684_s19 + $0x58] sm:$0xff]  ;;  %v213_v41 = vld [vmem:[%s684_s19 + $0x160] sm:$0xff] }
  0x89   : > { %469 = vst [vmem:[%s693_s22 + $0x70] sm:$0xff] %v363_v17  ;;  %v451_v54 = vmul.f32 %v347_v40, %v271_v48  ;;  %v452_v57 = vmul.f32 %v347_v40, %v272_v50  ;;  %v453_v59 = vmul.f32 %v347_v40, %v273_v52  ;;  %v370_v62 = vmul.f32 %v292_v55, %v190_v56  ;;  %v216_v46 = vld [vmem:[%s684_s19 + $0x178] sm:$0xff]  ;;  %v217_v48 = vld [vmem:[%s684_s19 + $0x180] sm:$0xff]  ;;  %v239_v52 = vld [vmem:[%s684_s19 + $0x230] sm:$0xff] }
  0x8a   : > { %470 = vst [vmem:[%s693_s22 + $0x78] sm:$0xff] %v364_v19  ;;  %v371_v0 = vmul.f32 %v292_v55, %v191_v58  ;;  %v372_v2 = vmul.f32 %v292_v55, %v192_v60  ;;  %v373_v4 = vmul.f32 %v292_v55, %v193_v61  ;;  %v374_v5 = vmul.f32 %v292_v55, %v194_v63  ;;  %v241_v56 = vld [vmem:[%s684_s19 + $0x240] sm:$0xff]  ;;  %v244_v61 = vld [vmem:[%s684_s19 + $0x258] sm:$0xff] }
  0x8b   : > { %471 = vst [vmem:[%s693_s22 + $0x80] sm:$0xff] %v365_v21  ;;  %v375_v8 = vmul.f32 %v292_v55, %v195_v1  ;;  %v376_v10 = vmul.f32 %v292_v55, %v196_v3  ;;  %v356_v13 = vmul.f32 %v282_v6, %v176_v7  ;;  %v357_v15 = vmul.f32 %v282_v6, %v177_v9  ;;  %v245_v63 = vld [vmem:[%s684_s19 + $0x260] sm:$0xff]  ;;  %v232_v3 = vld [vmem:[%s684_s19 + $0x1f8] sm:$0xff]  ;;  %v234_v7 = vld [vmem:[%s684_s19 + $0x208] sm:$0xff] }
  0x8c   : > { %472 = vst [vmem:[%s693_s22 + $0x88] sm:$0xff] %v366_v23  ;;  %v358_v17 = vmul.f32 %v282_v6, %v178_v11  ;;  %v359_v19 = vmul.f32 %v282_v6, %v179_v12  ;;  %v360_v20 = vmul.f32 %v282_v6, %v180_v14  ;;  %v361_v23 = vmul.f32 %v282_v6, %v181_v16  ;;  %v237_v12 = vld [vmem:[%s684_s19 + $0x220] sm:$0xff]  ;;  %v238_v14 = vld [vmem:[%s684_s19 + $0x228] sm:$0xff] }
  0x8d   : > { %473 = vst [vmem:[%s693_s22 + $0x90] sm:$0xff] %v367_v24  ;;  %v219_v24 = vld [vmem:[%s684_s19 + $0x190] sm:$0xff]  ;;  %v362_v25 = vmul.f32 %v282_v6, %v182_v18  ;;  %v260_v18 = vld [vmem:[%s684_s19 + $0x2d8] sm:$0xff] }
  0x8e   : > { %474 = vst [vmem:[%s693_s22 + $0x98] sm:$0xff] %v368_v27  ;;  %v221_v27 = vld [vmem:[%s684_s19 + $0x1a0] sm:$0xff] }
  0x8f   : > { %475 = vst.msk [vmem:[%s693_s22 + $0xa0] sm:$0xff] %vm460_vm0, %v369_v29  ;;  %v222_v29 = vld [vmem:[%s684_s19 + $0x1a8] sm:$0xff] }
  0x90   : > { %454 = vst [vmem:[%s693_s22] sm:$0xff] %v349_v32  ;;  %v312_v21 = vpop.permute.xlu1 %311 }
  0x91   : > { %455 = vst [vmem:[%s693_s22 + $0x8] sm:$0xff] %v350_v34  ;;  %v398_v28 = vmul.f32 %v312_v21, %v218_v22  ;;  %v399_v30 = vmul.f32 %v312_v21, %v219_v24  ;;  %v400_v32 = vmul.f32 %v312_v21, %v220_v26  ;;  %v401_v34 = vmul.f32 %v312_v21, %v221_v27  ;;  %v262_v22 = vld [vmem:[%s684_s19 + $0x2e8] sm:$0xff]  ;;  %v265_v27 = vld [vmem:[%s684_s19 + $0x300] sm:$0xff] }
  0x92   : > { %456 = vst [vmem:[%s693_s22 + $0x10] sm:$0xff] %v351_v36  ;;  %v402_v35 = vmul.f32 %v312_v21, %v222_v29  ;;  %v307_v36 = vpop.permute.xlu0 %306  ;;  %v404_v40 = vmul.f32 %v312_v21, %v224_v33  ;;  %v266_v29 = vld [vmem:[%s684_s19 + $0x308] sm:$0xff]  ;;  %v253_v33 = vld [vmem:[%s684_s19 + $0x2a0] sm:$0xff] }
  0x93   : > { %457 = vst [vmem:[%s693_s22 + $0x18] sm:$0xff] %v352_v38  ;;  %v403_v38 = vmul.f32 %v312_v21, %v223_v31  ;;  %v391_v43 = vmul.f32 %v307_v36, %v211_v37  ;;  %v397_v55 = vmul.f32 %v307_v36, %v217_v48  ;;  %v255_v37 = vld [vmem:[%s684_s19 + $0x2b0] sm:$0xff] }
  0x94   : > { %458 = vst [vmem:[%s693_s22 + $0x20] sm:$0xff] %v353_v39  ;;  %v212_v39 = vld [vmem:[%s684_s19 + $0x158] sm:$0xff] }
  0x95   : > { %459 = vst [vmem:[%s693_s22 + $0x28] sm:$0xff] %v354_v42  ;;  %v214_v42 = vld [vmem:[%s684_s19 + $0x168] sm:$0xff]  ;;  %v392_v45 = vmul.f32 %v307_v36, %v212_v39 }
  0x96   : > { %461 = vst.msk [vmem:[%s693_s22 + $0x30] sm:$0xff] %vm460_vm0, %v355_v44  ;;  %v215_v44 = vld [vmem:[%s684_s19 + $0x170] sm:$0xff] }
  0x97   : > { %553 = vst [vmem:[%s693_s22 + $0x310] sm:$0xff] %v447_v47  ;;  %v393_v47 = vmul.f32 %v307_v36, %v213_v41  ;;  %v395_v50 = vmul.f32 %v307_v36, %v215_v44  ;;  %v259_v44 = vld [vmem:[%s684_s19 + $0x2d0] sm:$0xff] }
  0x98   : > { %554 = vst [vmem:[%s693_s22 + $0x318] sm:$0xff] %v448_v49  ;;  %v394_v49 = vmul.f32 %v307_v36, %v214_v42  ;;  %v258_v42 = vld [vmem:[%s684_s19 + $0x2c8] sm:$0xff] }
  0x99   : > { %555 = vst [vmem:[%s693_s22 + $0x320] sm:$0xff] %v449_v51  ;;  %v327_v51 = vpop.permute.xlu1 %326 }
  0x9a   : > { %556 = vst [vmem:[%s693_s22 + $0x328] sm:$0xff] %v450_v53  ;;  %v396_v53 = vmul.f32 %v307_v36, %v216_v46  ;;  %v419_v58 = vmul.f32 %v327_v51, %v239_v52  ;;  %v425_v6 = vmul.f32 %v327_v51, %v245_v63 }
  0x9b   : > { %557 = vst [vmem:[%s693_s22 + $0x330] sm:$0xff] %v451_v54  ;;  %v240_v54 = vld [vmem:[%s684_s19 + $0x238] sm:$0xff] }
  0x9c   : > { %558 = vst [vmem:[%s693_s22 + $0x338] sm:$0xff] %v452_v57  ;;  %v242_v57 = vld [vmem:[%s684_s19 + $0x248] sm:$0xff]  ;;  %v420_v60 = vmul.f32 %v327_v51, %v240_v54 }
  0x9d   : > { %559 = vst.msk [vmem:[%s693_s22 + $0x340] sm:$0xff] %vm460_vm0, %v453_v59  ;;  %v243_v59 = vld [vmem:[%s684_s19 + $0x250] sm:$0xff] }
  0x9e   : > { %476 = vst [vmem:[%s693_s22 + $0xa8] sm:$0xff] %v370_v62  ;;  %v421_v62 = vmul.f32 %v327_v51, %v241_v56  ;;  %v423_v1 = vmul.f32 %v327_v51, %v243_v59 }
  0x9f   : > { %477 = vst [vmem:[%s693_s22 + $0xb0] sm:$0xff] %v371_v0  ;;  %v422_v0 = vmul.f32 %v327_v51, %v242_v57 }
  0xa0   : > { %478 = vst [vmem:[%s693_s22 + $0xb8] sm:$0xff] %v372_v2  ;;  %v322_v2 = vpop.permute.xlu0 %321 }
  0xa1   : > { %479 = vst [vmem:[%s693_s22 + $0xc0] sm:$0xff] %v373_v4  ;;  %v424_v4 = vmul.f32 %v327_v51, %v244_v61  ;;  %v412_v9 = vmul.f32 %v322_v2, %v232_v3  ;;  %v418_v21 = vmul.f32 %v322_v2, %v238_v14 }
  0xa2   : > { %480 = vst [vmem:[%s693_s22 + $0xc8] sm:$0xff] %v374_v5  ;;  %v233_v5 = vld [vmem:[%s684_s19 + $0x200] sm:$0xff] }
  0xa3   : > { %481 = vst [vmem:[%s693_s22 + $0xd0] sm:$0xff] %v375_v8  ;;  %v235_v8 = vld [vmem:[%s684_s19 + $0x210] sm:$0xff]  ;;  %v413_v11 = vmul.f32 %v322_v2, %v233_v5 }
  0xa4   : > { %482 = vst.msk [vmem:[%s693_s22 + $0xd8] sm:$0xff] %vm460_vm0, %v376_v10  ;;  %v236_v10 = vld [vmem:[%s684_s19 + $0x218] sm:$0xff] }
  0xa5   : > { %462 = vst [vmem:[%s693_s22 + $0x38] sm:$0xff] %v356_v13  ;;  %v414_v13 = vmul.f32 %v322_v2, %v234_v7  ;;  %v416_v16 = vmul.f32 %v322_v2, %v236_v10 }
  0xa6   : > { %463 = vst [vmem:[%s693_s22 + $0x40] sm:$0xff] %v357_v15  ;;  %v415_v15 = vmul.f32 %v322_v2, %v235_v8 }
  0xa7   : > { %464 = vst [vmem:[%s693_s22 + $0x48] sm:$0xff] %v358_v17  ;;  %v342_v17 = vpop.permute.xlu1 %341 }
  0xa8   : > { %465 = vst [vmem:[%s693_s22 + $0x50] sm:$0xff] %v359_v19  ;;  %v417_v19 = vmul.f32 %v322_v2, %v237_v12  ;;  %v440_v24 = vmul.f32 %v342_v17, %v260_v18  ;;  %v446_v36 = vmul.f32 %v342_v17, %v266_v29 }
  0xa9   : > { %466 = vst [vmem:[%s693_s22 + $0x58] sm:$0xff] %v360_v20  ;;  %v261_v20 = vld [vmem:[%s684_s19 + $0x2e0] sm:$0xff] }
  0xaa   : > { %467 = vst [vmem:[%s693_s22 + $0x60] sm:$0xff] %v361_v23  ;;  %v263_v23 = vld [vmem:[%s684_s19 + $0x2f0] sm:$0xff]  ;;  %v441_v26 = vmul.f32 %v342_v17, %v261_v20 }
  0xab   : > { %468 = vst.msk [vmem:[%s693_s22 + $0x68] sm:$0xff] %vm460_vm0, %v362_v25  ;;  %v264_v25 = vld [vmem:[%s684_s19 + $0x2f8] sm:$0xff] }
  0xac   : > { %504 = vst [vmem:[%s693_s22 + $0x188] sm:$0xff] %v398_v28  ;;  %v442_v28 = vmul.f32 %v342_v17, %v262_v22  ;;  %v444_v31 = vmul.f32 %v342_v17, %v264_v25 }
  0xad   : > { %505 = vst [vmem:[%s693_s22 + $0x190] sm:$0xff] %v399_v30  ;;  %v443_v30 = vmul.f32 %v342_v17, %v263_v23 }
  0xae   : > { %506 = vst [vmem:[%s693_s22 + $0x198] sm:$0xff] %v400_v32  ;;  %v337_v32 = vpop.permute.xlu0 %336 }
  0xaf   : > { %507 = vst [vmem:[%s693_s22 + $0x1a0] sm:$0xff] %v401_v34  ;;  %v445_v34 = vmul.f32 %v342_v17, %v265_v27  ;;  %v433_v39 = vmul.f32 %v337_v32, %v253_v33  ;;  %v439_v48 = vmul.f32 %v337_v32, %v259_v44 }
  0xb0   : > { %508 = vst [vmem:[%s693_s22 + $0x1a8] sm:$0xff] %v402_v35  ;;  %v254_v35 = vld [vmem:[%s684_s19 + $0x2a8] sm:$0xff] }
  0xb1   : > { %509 = vst [vmem:[%s693_s22 + $0x1b0] sm:$0xff] %v403_v38  ;;  %v256_v38 = vld [vmem:[%s684_s19 + $0x2b8] sm:$0xff]  ;;  %v434_v41 = vmul.f32 %v337_v32, %v254_v35 }
  0xb2   : > { %510 = vst.msk [vmem:[%s693_s22 + $0x1b8] sm:$0xff] %vm460_vm0, %v404_v40  ;;  %v257_v40 = vld [vmem:[%s684_s19 + $0x2c0] sm:$0xff] }
  0xb3   : > { %497 = vst [vmem:[%s693_s22 + $0x150] sm:$0xff] %v391_v43  ;;  %v435_v43 = vmul.f32 %v337_v32, %v255_v37  ;;  %v437_v46 = vmul.f32 %v337_v32, %v257_v40 }
  0xb4   : > { %498 = vst [vmem:[%s693_s22 + $0x158] sm:$0xff] %v392_v45  ;;  %v436_v45 = vmul.f32 %v337_v32, %v256_v38 }
  0xb5   : > { %499 = vst [vmem:[%s693_s22 + $0x160] sm:$0xff] %v393_v47  ;;  %v438_v47 = vmul.f32 %v337_v32, %v258_v42 }
  0xb6   : > { %500 = vst [vmem:[%s693_s22 + $0x168] sm:$0xff] %v394_v49 }
  0xb7   : > { %501 = vst [vmem:[%s693_s22 + $0x170] sm:$0xff] %v395_v50 }
  0xb8   : > { %502 = vst [vmem:[%s693_s22 + $0x178] sm:$0xff] %v396_v53 }
  0xb9   : > { %503 = vst.msk [vmem:[%s693_s22 + $0x180] sm:$0xff] %vm460_vm0, %v397_v55 }
  0xba   : > { %525 = vst [vmem:[%s693_s22 + $0x230] sm:$0xff] %v419_v58 }
  0xbb   : > { %526 = vst [vmem:[%s693_s22 + $0x238] sm:$0xff] %v420_v60 }
  0xbc   : > { %527 = vst [vmem:[%s693_s22 + $0x240] sm:$0xff] %v421_v62 }
  0xbd   : > { %528 = vst [vmem:[%s693_s22 + $0x248] sm:$0xff] %v422_v0 }
  0xbe   : > { %529 = vst [vmem:[%s693_s22 + $0x250] sm:$0xff] %v423_v1 }
  0xbf   : > { %530 = vst [vmem:[%s693_s22 + $0x258] sm:$0xff] %v424_v4 }
  0xc0   : > { %531 = vst.msk [vmem:[%s693_s22 + $0x260] sm:$0xff] %vm460_vm0, %v425_v6 }
  0xc1   : > { %518 = vst [vmem:[%s693_s22 + $0x1f8] sm:$0xff] %v412_v9 }
  0xc2   : > { %519 = vst [vmem:[%s693_s22 + $0x200] sm:$0xff] %v413_v11 }
  0xc3   : > { %520 = vst [vmem:[%s693_s22 + $0x208] sm:$0xff] %v414_v13 }
  0xc4   : > { %521 = vst [vmem:[%s693_s22 + $0x210] sm:$0xff] %v415_v15 }
  0xc5   : > { %522 = vst [vmem:[%s693_s22 + $0x218] sm:$0xff] %v416_v16 }
  0xc6   : > { %523 = vst [vmem:[%s693_s22 + $0x220] sm:$0xff] %v417_v19 }
  0xc7   : > { %524 = vst.msk [vmem:[%s693_s22 + $0x228] sm:$0xff] %vm460_vm0, %v418_v21 }
  0xc8   : > { %546 = vst [vmem:[%s693_s22 + $0x2d8] sm:$0xff] %v440_v24 }
  0xc9   : > { %547 = vst [vmem:[%s693_s22 + $0x2e0] sm:$0xff] %v441_v26 }
  0xca   : > { %548 = vst [vmem:[%s693_s22 + $0x2e8] sm:$0xff] %v442_v28 }
  0xcb   : > { %549 = vst [vmem:[%s693_s22 + $0x2f0] sm:$0xff] %v443_v30 }
  0xcc   : > { %550 = vst [vmem:[%s693_s22 + $0x2f8] sm:$0xff] %v444_v31 }
  0xcd   : > { %551 = vst [vmem:[%s693_s22 + $0x300] sm:$0xff] %v445_v34 }
  0xce   : > { %552 = vst.msk [vmem:[%s693_s22 + $0x308] sm:$0xff] %vm460_vm0, %v446_v36 }
  0xcf   : > { %539 = vst [vmem:[%s693_s22 + $0x2a0] sm:$0xff] %v433_v39 }
  0xd0   : > { %540 = vst [vmem:[%s693_s22 + $0x2a8] sm:$0xff] %v434_v41 }
  0xd1   : > { %541 = vst [vmem:[%s693_s22 + $0x2b0] sm:$0xff] %v435_v43 }
  0xd2   : > { %542 = vst [vmem:[%s693_s22 + $0x2b8] sm:$0xff] %v436_v45 }
  0xd3   : > { %543 = vst [vmem:[%s693_s22 + $0x2c0] sm:$0xff] %v437_v46 }
  0xd4   : > { %544 = vst [vmem:[%s693_s22 + $0x2c8] sm:$0xff] %v438_v47 }
  0xd5   : > { %545 = vst.msk [vmem:[%s693_s22 + $0x2d0] sm:$0xff] %vm460_vm0, %v439_v48 }
  0xd6 PF: > { %s12_s9 = sadd.s32 1, %s648_s9  }
  0xd7   : > { %p9_p4 = scmp.ge.s32.totalorder %s12_s9, 6  }
  0xd9   :  { %11 = sbr.rel (!%p9_p4) target bundleno = 1 (0x1), region = 59 }

</bundles_post_ra>
